<compile_context>
chip_gen: v6e
topology: v6e:2x2x1
jax: 0.10.0
libtpu: 0.0.40
codegen_flags: <defaults>
</compile_context>

<pallas_src>
import jax
import jax.numpy as jnp
from jax.experimental import pallas as pl
from jax.experimental.pallas import tpu as pltpu


_VMEM_LIMIT = 32 * 1024 * 1024  # safe scoped-VMEM cap on v5e/v6e/v7x


def _pick_block(total, target, quantum):
    """Largest block b <= target with total % b == 0 and b % quantum == 0,
    falling back to the full dimension (always a legal block)."""
    if total <= target:
        return total
    b = (min(target, total) // quantum) * quantum
    while b >= quantum:
        if total % b == 0:
            return b
        b -= quantum
    return total  # single full block — still correct, just less tiled.


# ---------------------------------------------------------------------------
# 4-D (conv feature map) kernels: x viewed as (N, C, HW), channels on sublanes
# ---------------------------------------------------------------------------

def _stats3d_kernel(x_ref, sum_ref, sq_ref):
    """x_ref: (1, C, hw_blk). Accumulate per-channel sum / sum(x^2)."""
    @pl.when((pl.program_id(0) == 0) & (pl.program_id(1) == 0))
    def _():
        sum_ref[...] = jnp.zeros_like(sum_ref)
        sq_ref[...] = jnp.zeros_like(sq_ref)

    x = x_ref[...].astype(jnp.float32)          # (1, C, hw_blk)
    sum_ref[...] += jnp.sum(x, axis=2)          # (1, C)
    sq_ref[...] += jnp.sum(x * x, axis=2)       # (1, C)


def _norm3d_kernel(x_ref, scale_ref, shift_ref, y_ref):
    """y = x * scale[c] + shift[c]; scale/shift blocks are (1, C, 1) f32."""
    # TODO(synk): for bf16 inputs on v6e/v7x keep the FMA in bf16 to halve the
    # VMEM tile footprint (v5e has no bf16 VPU, so keep f32 there).
    y = x_ref[...].astype(jnp.float32) * scale_ref[...] + shift_ref[...]
    y_ref[...] = y.astype(y_ref.dtype)


def _channel_stats_3d(x3, hw_blk):
    N, C, HW = x3.shape
    grid = (N, HW // hw_blk)
    return pl.pallas_call(
        _stats3d_kernel,
        out_shape=(jax.ShapeDtypeStruct((1, C), jnp.float32),
                   jax.ShapeDtypeStruct((1, C), jnp.float32)),
        grid=grid,
        in_specs=[pl.BlockSpec((1, C, hw_blk), lambda n, j: (n, 0, j))],
        out_specs=(pl.BlockSpec((1, C), lambda n, j: (0, 0)),
                   pl.BlockSpec((1, C), lambda n, j: (0, 0))),
        compiler_params=pltpu.CompilerParams(
            dimension_semantics=("arbitrary", "arbitrary"),
            vmem_limit_bytes=_VMEM_LIMIT),
    )(x3)


def _normalize_3d(x3, scale3, shift3, hw_blk):
    N, C, HW = x3.shape
    grid = (N, HW // hw_blk)
    return pl.pallas_call(
        _norm3d_kernel,
        out_shape=jax.ShapeDtypeStruct((N, C, HW), x3.dtype),
        grid=grid,
        in_specs=[pl.BlockSpec((1, C, hw_blk), lambda n, j: (n, 0, j)),
                  pl.BlockSpec((1, C, 1), lambda n, j: (0, 0, 0)),
                  pl.BlockSpec((1, C, 1), lambda n, j: (0, 0, 0))],
        out_specs=pl.BlockSpec((1, C, hw_blk), lambda n, j: (n, 0, j)),
        compiler_params=pltpu.CompilerParams(
            dimension_semantics=("parallel", "parallel"),
            vmem_limit_bytes=_VMEM_LIMIT),
    )(x3, scale3, shift3)


# ---------------------------------------------------------------------------
# 2-D (fully-connected) kernels: features on lanes, reduce over rows
# ---------------------------------------------------------------------------

def _stats2d_kernel(x_ref, sum_ref, sq_ref):
    @pl.when(pl.program_id(0) == 0)
    def _():
        sum_ref[...] = jnp.zeros_like(sum_ref)
        sq_ref[...] = jnp.zeros_like(sq_ref)

    x = x_ref[...].astype(jnp.float32)                    # (n_blk, F)
    sum_ref[...] += jnp.sum(x, axis=0, keepdims=True)     # (1, F)
    sq_ref[...] += jnp.sum(x * x, axis=0, keepdims=True)  # (1, F)


def _norm2d_kernel(x_ref, scale_ref, shift_ref, y_ref):
    y = x_ref[...].astype(jnp.float32) * scale_ref[...] + shift_ref[...]
    y_ref[...] = y.astype(y_ref.dtype)


def _feature_stats_2d(x2, n_blk):
    N, F = x2.shape
    grid = (N // n_blk,)
    return pl.pallas_call(
        _stats2d_kernel,
        out_shape=(jax.ShapeDtypeStruct((1, F), jnp.float32),
                   jax.ShapeDtypeStruct((1, F), jnp.float32)),
        grid=grid,
        in_specs=[pl.BlockSpec((n_blk, F), lambda i: (i, 0))],
        out_specs=(pl.BlockSpec((1, F), lambda i: (0, 0)),
                   pl.BlockSpec((1, F), lambda i: (0, 0))),
        compiler_params=pltpu.CompilerParams(
            dimension_semantics=("arbitrary",),
            vmem_limit_bytes=_VMEM_LIMIT),
    )(x2)


def _normalize_2d(x2, scale, shift, n_blk):
    N, F = x2.shape
    grid = (N // n_blk,)
    return pl.pallas_call(
        _norm2d_kernel,
        out_shape=jax.ShapeDtypeStruct((N, F), x2.dtype),
        grid=grid,
        in_specs=[pl.BlockSpec((n_blk, F), lambda i: (i, 0)),
                  pl.BlockSpec((1, F), lambda i: (0, 0)),
                  pl.BlockSpec((1, F), lambda i: (0, 0))],
        out_specs=pl.BlockSpec((n_blk, F), lambda i: (i, 0)),
        compiler_params=pltpu.CompilerParams(
            dimension_semantics=("parallel",),
            vmem_limit_bytes=_VMEM_LIMIT),
    )(x2, scale, shift)


# ---------------------------------------------------------------------------
# Forward pass matching the PyTorch module semantics
# ---------------------------------------------------------------------------

def batch_norm_forward(x, gamma, beta, moving_mean, moving_var,
                       eps=1e-5, momentum=0.9, is_training=True):
    """Returns (Y, new_moving_mean, new_moving_var), same conventions as the
    PyTorch module.  x: (N, C) or (N, C, H, W)."""
    assert x.ndim in (2, 4)
    f32 = jnp.float32

    if x.ndim == 4:
        N, C, H, W = x.shape
        HW = H * W
        x3 = x.reshape(N, C, HW)  # free contiguous reshape, no HBM transpose
        hw_blk = _pick_block(
            HW, max(128, min(2048, (2 << 20) // max(4 * C, 1))), 128)

        if is_training:
            s, sq = _channel_stats_3d(x3, hw_blk)          # (1, C) each, f32
            count = N * HW
            mean = s / count
            # Single-sweep variance; f32 accumulation, clamped for safety.
            var = jnp.maximum(sq / count - mean * mean, 0.0)
        else:
            mean = moving_mean.reshape(1, C).astype(f32)
            var = moving_var.reshape(1, C).astype(f32)

        inv_std = jax.lax.rsqrt(var + eps)
        scale = gamma.reshape(1, C).astype(f32) * inv_std          # (1, C)
        shift = beta.reshape(1, C).astype(f32) - mean * scale      # (1, C)

        y3 = _normalize_3d(x3, scale.reshape(1, C, 1),
                           shift.reshape(1, C, 1), hw_blk)
        y = y3.reshape(N, C, H, W)

        if is_training:
            mean_p = mean.reshape(1, C, 1, 1)
            var_p = var.reshape(1, C, 1, 1)
            new_mm = momentum * moving_mean + (1.0 - momentum) * mean_p
            new_mv = momentum * moving_var + (1.0 - momentum) * var_p
        else:
            new_mm, new_mv = moving_mean, moving_var
        return y, new_mm, new_mv

    # ---- 2-D (N, F) fully-connected case ----
    N, F = x.shape
    n_blk = _pick_block(N, max(8, min(1024, (2 << 20) // max(4 * F, 1))), 8)

    if is_training:
        s, sq = _feature_stats_2d(x, n_blk)
        mean = s / N
        var = jnp.maximum(sq / N - mean * mean, 0.0)
    else:
        mean = moving_mean.reshape(1, F).astype(f32)
        var = moving_var.reshape(1, F).astype(f32)

    inv_std = jax.lax.rsqrt(var + eps)
    scale = gamma.reshape(1, F).astype(f32) * inv_std
    shift = beta.reshape(1, F).astype(f32) - mean * scale
    y = _normalize_2d(x, scale, shift, n_blk)

    if is_training:
        new_mm = momentum * moving_mean + (1.0 - momentum) * mean
        new_mv = momentum * moving_var + (1.0 - momentum) * var
    else:
        new_mm, new_mv = moving_mean, moving_var
    return y, new_mm, new_mv


def _reference_batch_norm(x, gamma, beta, moving_mean, moving_var,
                          eps=1e-5, momentum=0.9):
    """Pure-JAX mirror of the PyTorch training path, for validation."""
    if x.ndim == 2:
        mean = x.mean(axis=0)
        var = ((x - mean) ** 2).mean(axis=0)
    else:
        mean = x.mean(axis=(0, 2, 3), keepdims=True)
        var = ((x - mean) ** 2).mean(axis=(0, 2, 3), keepdims=True)
    x_hat = (x - mean) / jnp.sqrt(var + eps)
    y = gamma * x_hat + beta
    new_mm = momentum * moving_mean + (1.0 - momentum) * mean
    new_mv = momentum * moving_var + (1.0 - momentum) * var
    return y, new_mm, new_mv


if __name__ == "__main__":
    # 4-D case: conv feature map in NCHW (LeNet-style).
    N, C, H, W = 2, 4, 16, 16
    x = jax.random.normal(jax.random.PRNGKey(0), (N, C, H, W),
                          dtype=jnp.float32) * 2.0 + 0.5
    gamma = jnp.ones((1, C, 1, 1), jnp.float32)
    beta = jnp.zeros((1, C, 1, 1), jnp.float32)
    mm0 = jnp.zeros((1, C, 1, 1), jnp.float32)
    mv0 = jnp.zeros((1, C, 1, 1), jnp.float32)

    y, mm, mv = batch_norm_forward(x, gamma, beta, mm0, mv0, is_training=True)
    jax.block_until_ready((y, mm, mv))

    y_ref, mm_ref, mv_ref = _reference_batch_norm(x, gamma, beta, mm0, mv0)
    assert y.shape == (N, C, H, W)
    assert jnp.allclose(y, y_ref, atol=1e-4, rtol=1e-4)
    assert jnp.allclose(mm, mm_ref, atol=1e-5, rtol=1e-5)
    assert jnp.allclose(mv, mv_ref, atol=1e-5, rtol=1e-5)

    # Eval path (reuses the normalize kernel with the moving statistics).
    y_eval, _, _ = batch_norm_forward(x, gamma, beta, mm, mv, is_training=False)
    jax.block_until_ready(y_eval)
    y_eval_ref = gamma * (x - mm) / jnp.sqrt(mv + 1e-5) + beta
    assert jnp.allclose(y_eval, y_eval_ref, atol=1e-4, rtol=1e-4)

    # 2-D case: FC-layer activations.
    Nf, F = 8, 32
    x2 = jax.random.normal(jax.random.PRNGKey(1), (Nf, F), dtype=jnp.float32)
    g2 = jnp.ones((1, F), jnp.float32)
    b2 = jnp.zeros((1, F), jnp.float32)
    mm2 = jnp.zeros((1, F), jnp.float32)
    mv2 = jnp.zeros((1, F), jnp.float32)
    y2, mm2n, mv2n = batch_norm_forward(x2, g2, b2, mm2, mv2, is_training=True)
    jax.block_until_ready((y2, mm2n, mv2n))
    y2_ref, mm2_ref, mv2_ref = _reference_batch_norm(x2, g2, b2, mm2, mv2)
    assert jnp.allclose(y2, y2_ref, atol=1e-4, rtol=1e-4)
    assert jnp.allclose(mm2n, mm2_ref, atol=1e-5, rtol=1e-5)
    assert jnp.allclose(mv2n, mv2_ref, atol=1e-5, rtol=1e-5)

    print("KERNEL_OK")
</pallas_src>

<mosaic_0001>
module attributes {stable_mosaic.version = 11 : i64} {
  func.func @_stats3d_kernel(%arg0: i32, %arg1: i32, %arg2: memref<1x4x256xf32, #tpu.memory_space<vmem>>, %arg3: memref<1x4xf32, #tpu.memory_space<vmem>>, %arg4: memref<1x4xf32, #tpu.memory_space<vmem>>) attributes {dimension_semantics = [#tpu.dimension_semantics<arbitrary>, #tpu.dimension_semantics<arbitrary>], iteration_bounds = array<i64: 2, 1>, scalar_prefetch = 0 : i64, scratch_operands = 0 : i64, tpu.core_type = #tpu.core_type<tc>, window_params = [{transform_indices = @transform_0, window_bounds = array<i64: 1, 4, 256>}, {pipeline_mode = #tpu.pipeline_mode<synchronous>, transform_indices = @transform_1, window_bounds = array<i64: 1, 4>}, {pipeline_mode = #tpu.pipeline_mode<synchronous>, transform_indices = @transform_2, window_bounds = array<i64: 1, 4>}]} {
    %c0_i32 = arith.constant 0 : i32
    %0 = arith.cmpi eq, %arg0, %c0_i32 : i32
    %c0_i32_0 = arith.constant 0 : i32
    %1 = arith.cmpi eq, %arg1, %c0_i32_0 : i32
    %2 = arith.andi %0, %1 : i1
    %3 = arith.extui %2 : i1 to i32
    %c0_i32_1 = arith.constant 0 : i32
    %4 = arith.cmpi ne, %3, %c0_i32_1 : i32
    scf.if %4 {
      %cst_13 = arith.constant 0.000000e+00 : f32
      %15 = vector.broadcast %cst_13 : f32 to vector<1x4xf32>
      %c0_14 = arith.constant 0 : index
      %c0_15 = arith.constant 0 : index
      %16 = vector.load %arg3[%c0_14, %c0_15] : memref<1x4xf32, #tpu.memory_space<vmem>>, vector<1x4xf32>
      tpu.vector_store %arg3[%c0_14, %c0_15], %15 {strides = array<i32>} : memref<1x4xf32, #tpu.memory_space<vmem>>, vector<1x4xf32>,
      %cst_16 = arith.constant 0.000000e+00 : f32
      %17 = vector.broadcast %cst_16 : f32 to vector<1x4xf32>
      %c0_17 = arith.constant 0 : index
      %c0_18 = arith.constant 0 : index
      %18 = vector.load %arg4[%c0_17, %c0_18] : memref<1x4xf32, #tpu.memory_space<vmem>>, vector<1x4xf32>
      tpu.vector_store %arg4[%c0_17, %c0_18], %17 {strides = array<i32>} : memref<1x4xf32, #tpu.memory_space<vmem>>, vector<1x4xf32>,
    } else {
    }
    %c0 = arith.constant 0 : index
    %c0_2 = arith.constant 0 : index
    %c0_3 = arith.constant 0 : index
    %5 = vector.load %arg2[%c0, %c0_2, %c0_3] : memref<1x4x256xf32, #tpu.memory_space<vmem>>, vector<1x4x256xf32>
    %c0_4 = arith.constant 0 : index
    %c0_5 = arith.constant 0 : index
    %6 = vector.load %arg3[%c0_4, %c0_5] : memref<1x4xf32, #tpu.memory_space<vmem>>, vector<1x4xf32>
    %cst = arith.constant dense<0.000000e+00> : vector<1x4xf32>
    %7 = vector.multi_reduction <add>, %5, %cst [2] : vector<1x4x256xf32> to vector<1x4xf32>
    %8 = arith.addf %6, %7 : vector<1x4xf32>
    %c0_6 = arith.constant 0 : index
    %c0_7 = arith.constant 0 : index
    %9 = vector.load %arg3[%c0_6, %c0_7] : memref<1x4xf32, #tpu.memory_space<vmem>>, vector<1x4xf32>
    tpu.vector_store %arg3[%c0_6, %c0_7], %8 {strides = array<i32>} : memref<1x4xf32, #tpu.memory_space<vmem>>, vector<1x4xf32>,
    %c0_8 = arith.constant 0 : index
    %c0_9 = arith.constant 0 : index
    %10 = vector.load %arg4[%c0_8, %c0_9] : memref<1x4xf32, #tpu.memory_space<vmem>>, vector<1x4xf32>
    %11 = arith.mulf %5, %5 : vector<1x4x256xf32>
    %cst_10 = arith.constant dense<0.000000e+00> : vector<1x4xf32>
    %12 = vector.multi_reduction <add>, %11, %cst_10 [2] : vector<1x4x256xf32> to vector<1x4xf32>
    %13 = arith.addf %10, %12 : vector<1x4xf32>
    %c0_11 = arith.constant 0 : index
    %c0_12 = arith.constant 0 : index
    %14 = vector.load %arg4[%c0_11, %c0_12] : memref<1x4xf32, #tpu.memory_space<vmem>>, vector<1x4xf32>
    tpu.vector_store %arg4[%c0_11, %c0_12], %13 {strides = array<i32>} : memref<1x4xf32, #tpu.memory_space<vmem>>, vector<1x4xf32>,
    return
  }
  func.func @transform_0(%arg0: i32, %arg1: i32) -> (i32, i32, i32) {
    %c0_i32 = arith.constant 0 : i32
    %c0_i32_0 = arith.constant 0 : i32
    return %arg0, %c0_i32, %arg1 : i32, i32, i32
  }
  func.func @transform_1(%arg0: i32, %arg1: i32) -> (i32, i32) {
    %c0_i32 = arith.constant 0 : i32
    %c0_i32_0 = arith.constant 0 : i32
    %c0_i32_1 = arith.constant 0 : i32
    return %c0_i32, %c0_i32_0 : i32, i32
  }
  func.func @transform_2(%arg0: i32, %arg1: i32) -> (i32, i32) {
    %c0_i32 = arith.constant 0 : i32
    %c0_i32_0 = arith.constant 0 : i32
    %c0_i32_1 = arith.constant 0 : i32
    return %c0_i32, %c0_i32_0 : i32, i32
  }
}

</mosaic_0001>

<bundles_post_ra>
// kernel: tpu_custom_call.1
= control target key start
LH: loop header
LB: loop body
LE: loop exit
PB: predicated region body
PF: predicated region fallthrough
CT: control target
= control target key end

     0   :  { %8 = vsyncpa [#allocation3], 0  ;;  %s795_s0 = inlined_call_operand.hbm [shape: f32[2,4,256], index: 0, kind: input, shape index: {}]   ;;  %s796_s1 = inlined_call_operand.hbm [shape: f32[1,4], index: 1, kind: output, shape index: {0}]   ;;  %s797_s2 = inlined_call_operand.hbm [shape: f32[1,4], index: 2, kind: output, shape index: {1}]  }
   0x1   :  { %10 = vsyncpa [#allocation3 + $0x1], 0 }
   0x2   :  { %11 = vsyncpa [#allocation4], 0 }
   0x3   :  { %12 = vsyncpa [#allocation7], 0  ;;  %s667_s9 = smov 0   ;;  %s669_s10 = smov 0  }
   0x4   :  { %s671_s11 = smov 0   ;;  %s673_s12 = smov 0  }
   0x5   :  { %s675_s13 = smov 0   ;;  %s677_s14 = smov 0  }
   0x6 LB: > { %s418_s15 = sadd.s32 4294967295, %s644_s14   ;;  %s30_s16 = sadd.s32 1, %s640_s13  ;;  %s644_s14 = sphi %s677_s14, %s18_s14   ;;  %s640_s13 = sphi %s675_s13, %s806_s13   ;;  %s636_s12 = sphi %s673_s12, %s805_s12   ;;  %s632_s11 = sphi %s671_s11, %s804_s11   ;;  %s628_s10 = sphi %s669_s10, %s803_s10   ;;  %s624_s9 = sphi %s667_s9, %s802_s9  }
   0x7   : > { %p32_p0 = scmp.ge.s32.totalorder %s30_s16, 2  ;;  %s39_s17 = sadd.s32 1, %s632_s11 }
   0x8   : > { %p46_p1 = scmp.ne.s32.totalorder %s632_s11, %s628_s10  ;;  %p47_p2 = scmp.eq.s32.totalorder %s644_s14, 0 }
   0x9   : > { %s808_s16 = smov (%p32_p0, %s30_s16), 0  ;;  %p52_p4 = scmp.ne.s32.totalorder %s628_s10, %s624_s9 }
   0xa   : > { %p703_p3 = por %p47_p2, %p46_p1  ;;  %s34_s19 = ssub.s32 %s640_s13, %s808_s16 }
   0xb   : > { %p53_p5 = scmp.eq.s32.totalorder %s418_s15, 0  ;;  %p37_p6 = scmp.eq.s32.totalorder %s34_s19, 0 }
   0xc   : > { %p449_p8 = scmp.lt.s32.totalorder %s644_s14, 2  ;;  %s118_s22 = sand.u32 1, %s632_s11  }
   0xd   : > { %p712_p7 = por %p53_p5, %p52_p4  ;;  %s433_s23 = sshll.u32 %s640_s13, 7 }
   0xe   : > { %s718_s21 = scalar_select %p37_p6, %s632_s11, %s39_s17  }
   0xf   : > { %s421_s24 = sshll.u32 %s118_s22, 3  ;;  %s130_s27 = scalar_lea.hbm %s795_s0, %s433_s23 }
  0x10   : > { %s122_s28 = scalar_lea.vmem [#allocation2], %s421_s24  ;;  %p727_p9 = pnand %p449_p8, %p703_p3 }
  0x11   : > { %s132_s29 = sshll.u32 %s122_s28, 4  ;;  %p424_p10 = scmp.ge.s32.totalorder %s644_s14, 1  ;;  %s133_s29 = int_to_ptr.vmem [resolvable:$true] %s132_s29 }
  0x12   : > { %p137_p11 = scmp.lt.s32.totalorder %s644_s14, 3  ;;  %s119_s3 = scalar_lea.sflag [#allocation3], %s118_s22 }
  0x13   : > { %p512_p12 = pneg %p727_p9  ;;  %s523_s4 = scalar_lea.vmem %s133_s29, 128 }
  0x14   : > { %p524_p13 = scmp.ne.s32.totalorder %s133_s29, %s523_s4  ;;  %s646_s5 = smov [#allocation2]  }
  0x15   : > { %s528_s6 = sshll.u32 %s646_s5, 4  ;;  %s529_s6 = int_to_ptr.vmem [resolvable:$false] %s528_s6 }
  0x16   : > { %p526_p0 = pnand %p524_p13, %p512_p12  ;;  %s530_s7 = scalar_lea.vmem %s529_s6, 256 }
  0x17   : > { %p531_p2 = scmp.lt.s32.totalorder %s133_s29, %s529_s6  ;;  %p532_p3 = scmp.lt.s32.totalorder %s530_s7, %s523_s4 }
  0x18   : > { %p527_p1 = pneg %p526_p0 }
  0x19   : > { %p533_p4 = por %p532_p3, %p531_p2 }
  0x1b   : > { %p534_p5 = pnand %p533_p4, %p527_p1 }
  0x1d   : > { %537 = shalt.err (!%p534_p5)
}
  0x1e   : > { %448 = dma.hbm_to_vmem [thread:$0]  (!%p727_p9), %s130_s27, 128, %s133_s29, %s119_s3  }
  0x1f   : > { %p138_p6 = pnand %p424_p10, %p137_p11 }
  0x20   : > { %s143_s8 = sand.u32 (!%p138_p6), 1, %s628_s10  }
  0x21   : > { %141 = sbr.rel (%p138_p6) target bundleno = 351 (0x15f), region = 24  ;;  %s425_s9 = sshll.u32 (!%p138_p6), %s143_s8, 3 }
  0x22   : > { %s144_s17 = scalar_lea.sflag (!%p138_p6), [#allocation3], %s143_s8  ;;  %s147_s18 = scalar_lea.vmem (!%p138_p6), [#allocation2], %s425_s9 }
  0x26   : > { %611 = dma.done.wait (%p712_p7), %s144_s17, 128  }
  0x27   : > { %613 = vsyncadd (%p712_p7), %s144_s17, 4294967168  ;;  %p164_p8 = scmp.eq.s32.totalorder %s636_s12, 0 }
  0x28   : > { %vm170_vm0 = vcmask (%p164_p8), 24576   ;;  %v647_v0 = vmov (%p164_p8), 0.0  }
  0x29   : > { %169 = sbr.rel (!%p164_p8) target bundleno = 46 (0x2e), region = 32  ;;  %171 = vst.msk [vmem:[#allocation5] sm:$0x1] (%p164_p8), %vm170_vm0, %v647_v0  ;;  %172 = vst.msk [vmem:[#allocation6] sm:$0x1] (%p164_p8), %vm170_vm0, %v647_v0 }
  0x2e PF: > { %v173_v1 = vld [vmem:[%s147_s18] sm:$0xff]  ;;  %vm178_vm1 = vcmask 1043456   ;;  %v648_v11 = vmov 0   ;;  %v185_v12 = vlaneseq  ;;  %v649_v16 = vmov 1966171168   ;;  %s650_s12 = smov [#allocation5]  }
  0x2f   : > { %v176_v2 = vcombine.high %v173_v1, %v173_v1  ;;  %v179_v3 = vsel %vm178_vm1, %v173_v1, 0.0  ;;  %v253_v4 = vmul.f32 %v173_v1, %v173_v1  ;;  %507 = vset.pattern.permute.xlu1 %v648_v11  ;;  %508 = vset.pattern.permute.xlu0 %v648_v11  ;;  %v204_v17 = vunpack.c.l.s4 %v649_v16  ;;  %s334_s19 = sshll.u32 %s650_s12, 4  ;;  %p749_p7 = scmp.eq.s32.totalorder %s418_s15, 1  ;;  %s335_s19 = int_to_ptr.vmem [resolvable:$true] %s334_s19 }
  0x30   : > { %v186_v13 = vshrl.u32 %v185_v12, 7  ;;  %v229_v14 = vand.u32 127, %v185_v12  ;;  %v174_v50 = vld [vmem:[#allocation5] sm:$0x1]  ;;  %vm250_vm2 = vcmask 24576   ;;  %s651_s22 = smov [#allocation6]   ;;  %p545_p12 = scmp.lt.s32.totalorder %s335_s19, %s335_s19 }
  0x31   : > { %v180_v5 = vsel %vm178_vm1, %v176_v2, 0.0  ;;  %v255_v6 = vcombine.high %v253_v4, %v253_v4  ;;  %v257_v7 = vsel %vm178_vm1, %v253_v4, 0.0  ;;  %v205_v22 = vunpack.c.0.s8 %v204_v17  ;;  %v252_v55 = vld [vmem:[#allocation6] sm:$0x1]  ;;  %s345_s23 = sshll.u32 %s651_s22, 4  ;;  %s538_s24 = scalar_lea.vmem %s335_s19, 16  ;;  %s346_s23 = int_to_ptr.vmem [resolvable:$true] %s345_s23 }
  0x32   : > { %v181_v8 = vadd.f32 %v180_v5, %v179_v3  ;;  %v232_v15 = vsub.s32 %v229_v14, %v186_v13  ;;  %v187_v18 = vsub.s32 0, %v186_v13  ;;  %v191_v19 = vsub.s32 1, %v186_v13  ;;  %p539_p9 = scmp.ne.s32.totalorder %s335_s19, %s538_s24  ;;  %s544_s25 = scalar_lea.vmem %s335_s19, 32 }
  0x33   : > { %v258_v9 = vsel %vm178_vm1, %v255_v6, 0.0  ;;  %v195_v20 = vsub.s32 2, %v186_v13  ;;  %v199_v21 = vsub.s32 3, %v186_v13  ;;  %v208_v28 = vsub.s32 %v205_v22, %v186_v13  ;;  %p546_p13 = scmp.lt.s32.totalorder %s544_s25, %s538_s24 }
  0x34   : > { %182 = vadd.xlane.f32.xlu0 %v181_v8  ;;  %v259_v10 = vadd.f32 %v258_v9, %v257_v7  ;;  %p540_p10 = pnand %p539_p9, %p749_p7 }
  0x35   : > { %p547_p0 = por %p546_p13, %p545_p12 }
  0x36   : > { %p541_p11 = pneg %p540_p10 }
  0x38   : > { %260 = vadd.xlane.f32.xlu0 %v259_v10  ;;  %p548_p1 = pnand %p547_p0, %p541_p11 }
  0xbd   : > { %v183_v23 = vpop.xlane.xlu0 %182 }
  0xbe   : > { %v188_v24 = vrot.slane %v183_v23, %v187_v18  ;;  %v192_v25 = vrot.slane %v183_v23, %v191_v19  ;;  %v196_v26 = vrot.slane %v183_v23, %v195_v20  ;;  %v200_v27 = vrot.slane %v183_v23, %v199_v21 }
  0xc0   : > { %v201_v29 = vcombine.low %v188_v24, %v192_v25  ;;  %v202_v30 = vcombine.low %v196_v26, %v200_v27 }
  0xc1   : > { %v261_v31 = vpop.xlane.xlu0 %260 }
  0xc2   : > { %v266_v32 = vrot.slane %v261_v31, %v187_v18  ;;  %v270_v33 = vrot.slane %v261_v31, %v191_v19  ;;  %v274_v34 = vrot.slane %v261_v31, %v195_v20  ;;  %v278_v35 = vrot.slane %v261_v31, %v199_v21 }
  0xc3   : > { %v209_v36 = vrot.slane %v201_v29, %v208_v28  ;;  %v216_v37 = vrot.slane %v202_v30, %v208_v28 }
  0xc4   : > { %v279_v38 = vcombine.low %v266_v32, %v270_v33  ;;  %v280_v39 = vcombine.low %v274_v34, %v278_v35 }
  0xc5   : > { %v217_v40 = vcombine.low %v209_v36, %v216_v37 }
  0xc6   : > { %v287_v41 = vrot.slane %v279_v38, %v208_v28  ;;  %v294_v42 = vrot.slane %v280_v39, %v208_v28 }
  0xc7   : > { %v224_v43 = vrot.slane %v217_v40, %v208_v28 }
  0xc8   : > { %v295_v44 = vcombine.low %v287_v41, %v294_v42 }
  0xc9   : > { %226 = vperm.xlu1 %507, %v224_v43  }
  0xca   : > { %v302_v45 = vrot.slane %v295_v44, %v208_v28 }
  0xcd   : > { %304 = vperm.xlu1 %507, %v302_v45  }
 0x144   : > { %v227_v46 = vpop.permute.xlu1 %226 }
 0x145   : > { %v233_v47 = vrot.slane %v227_v46, %v232_v15 }
 0x147   : > { %v240_v48 = vrot.slane %v233_v47, %v208_v28 }
 0x148   : > { %v305_v49 = vpop.permute.xlu1 %304 }
 0x149   : > { %v247_v51 = vrot.slane %v240_v48, %v208_v28  ;;  %v309_v52 = vrot.slane %v305_v49, %v232_v15 }
 0x14b   : > { %v316_v53 = vrot.slane %v309_v52, %v208_v28  ;;  %v249_v54 = vadd.f32 %v247_v51, %v174_v50 }
 0x14d   : > { %v323_v56 = vrot.slane %v316_v53, %v208_v28  ;;  %251 = vst.msk [vmem:[#allocation5] sm:$0x1] %vm250_vm2, %v249_v54 }
 0x14e   : > { %551 = shalt.err (!%p548_p1)
}
 0x14f   : > { %438 = dma.vmem_to_hbm [thread:$0]  (%p749_p7), %s335_s19, 16, %s796_s1, [#allocation4]   ;;  %v325_v57 = vadd.f32 %v323_v56, %v252_v55 }
 0x150   : > { %s562_s27 = scalar_lea.vmem %s346_s23, 16  ;;  %s568_s28 = scalar_lea.vmem %s346_s23, 32 }
 0x151   : > { %326 = vst.msk [vmem:[#allocation6] sm:$0x1] %vm250_vm2, %v325_v57  ;;  %p563_p2 = scmp.ne.s32.totalorder %s346_s23, %s562_s27  ;;  %p569_p5 = scmp.lt.s32.totalorder %s346_s23, %s346_s23 }
 0x152   : > { %p570_p6 = scmp.lt.s32.totalorder %s568_s28, %s562_s27 }
 0x153   : > { %p564_p3 = pnand %p563_p2, %p749_p7 }
 0x154   : > { %p571_p8 = por %p570_p6, %p569_p5 }
 0x155   : > { %p565_p4 = pneg %p564_p3 }
 0x157   : > { %p572_p9 = pnand %p571_p8, %p565_p4 }
 0x159   : > { %575 = shalt.err (!%p572_p9)
}
 0x15a   : > { %440 = dma.vmem_to_hbm [thread:$0]  (%p749_p7), %s346_s23, 16, %s797_s2, [#allocation7]  }
 0x15b   : > { %615 = dma.done.wait (%p749_p7), [#allocation4], 16  }
 0x15c   : > { %617 = vsyncadd (%p749_p7), [#allocation4], 4294967280 }
 0x15d   : > { %619 = dma.done.wait (%p749_p7), [#allocation7], 16  }
 0x15e   : > { %621 = vsyncadd (%p749_p7), [#allocation7], 4294967280 }
 0x15f PF: > { %s18_s14 = sadd.s32 1, %s644_s14   ;;  %s802_s9 = smov %s628_s10 }
 0x160   : > { %p15_p10 = scmp.ge.s32.totalorder %s18_s14, 4   ;;  %s803_s10 = smov %s632_s11 }
 0x161   : > { %s804_s11 = smov %s718_s21  ;;  %s805_s12 = smov %s640_s13 }
 0x162   : > { %s806_s13 = smov %s808_s16  ;;  %17 = sbr.rel (!%p15_p10) target bundleno = 6 (0x6), region = 73 }
 0x167   :  { %362 = vsyncpa [#allocation3], 1 }
 0x168   :  { %364 = vsyncpa [#allocation3 + $0x1], 1 }
 0x169   :  { %365 = vsyncpa [#allocation4], 1 }
 0x16a   :  { %367 = vsyncpa [#allocation4 + $0x1], 1 }
 0x16b   :  { %368 = vsyncpa [#allocation7], 1 }

</bundles_post_ra>
